<compile_context>
chip_gen: v7x
topology: tpu7x:2x2x1
jax: 0.10.0
libtpu: 0.0.40
codegen_flags: <defaults>
</compile_context>

<pallas_src>
import functools

import jax
import jax.numpy as jnp
from jax.experimental import pallas as pl
from jax.experimental.pallas import tpu as pltpu


def _round_up(x, m):
    return (x + m - 1) // m * m


def _vmem_budget():
    """Generation-aware usable VMEM (leave headroom for compiler scratch)."""
    cap = 64 << 20  # conservative default (v7x per-TC VMEM)
    try:
        info = pltpu.get_tpu_info()
        cap = int(getattr(info, "vmem_capacity_bytes", cap))
    except Exception:
        pass
    return max(cap - (16 << 20), 32 << 20)


# ---------------------------------------------------------------- pooling ---
def _pool_kernel(x_ref, pooled_ref, acc_ref, *, inv_hw, hw, hw_tile, need_mask):
    hw_step = pl.program_id(1)

    @pl.when(hw_step == 0)
    def _():
        acc_ref[...] = jnp.zeros_like(acc_ref)

    x = x_ref[...].astype(jnp.float32)
    if need_mask:
        # Mask lanes beyond the true HW extent (ragged last HW block reads
        # unspecified data that must not enter the sum).
        lane = jax.lax.broadcasted_iota(jnp.int32, x.shape, dimension=1)
        x = jnp.where(hw_step * hw_tile + lane < hw, x, 0.0)

    # Per-step cross-lane reduce (XLU slot, hidden under the HBM DMA); the
    # accumulator is only (row_tile, 1).
    acc_ref[...] += jnp.sum(x, axis=-1, keepdims=True)

    @pl.when(hw_step == pl.num_programs(1) - 1)
    def _():
        pooled_ref[...] = (acc_ref[...] * inv_hw).astype(pooled_ref.dtype)


def _avg_pool_rows(x2, hw, *, row_tile, hw_tile, vmem_budget):
    """x2: (NR, HW) float32 (unpadded). Returns per-row mean as (NR, 1)."""
    nr = x2.shape[0]
    grid = (pl.cdiv(nr, row_tile), pl.cdiv(hw, hw_tile))
    need_mask = (hw % hw_tile) != 0

    tile_bytes = row_tile * hw_tile * x2.dtype.itemsize
    # Double-buffered input + tiny accumulator/output + headroom.
    needed = 2 * tile_bytes + 2 * row_tile * 4 + (4 << 20)
    vmem_limit = int(min(max(needed, 32 << 20), vmem_budget))

    return pl.pallas_call(
        functools.partial(
            _pool_kernel,
            inv_hw=float(1.0 / hw),
            hw=hw,
            hw_tile=hw_tile,
            need_mask=need_mask,
        ),
        out_shape=jax.ShapeDtypeStruct((nr, 1), jnp.float32),
        grid_spec=pltpu.PrefetchScalarGridSpec(
            num_scalar_prefetch=0,
            grid=grid,
            in_specs=[pl.BlockSpec((row_tile, hw_tile), lambda r, h: (r, h))],
            out_specs=pl.BlockSpec((row_tile, 1), lambda r, h: (r, 0)),
            scratch_shapes=[pltpu.VMEM((row_tile, 1), jnp.float32)],
        ),
        compiler_params=pltpu.CompilerParams(
            dimension_semantics=("parallel", "arbitrary"),
            vmem_limit_bytes=vmem_limit,
        ),
        cost_estimate=pl.CostEstimate(
            flops=nr * hw,
            transcendentals=0,
            bytes_accessed=nr * hw * x2.dtype.itemsize + nr * 4,
        ),
    )(x2)


# -------------------------------------------------------------------- MLP ---
def _mlp_kernel(p_ref, w1_ref, b1_ref, w2_ref, b2_ref, w3_ref, b3_ref, rx_ref):
    p = p_ref[...]
    h = jnp.dot(p, w1_ref[...], preferred_element_type=jnp.float32) + b1_ref[...]
    h = jnp.maximum(h, 0.0)
    h = jnp.dot(h, w2_ref[...], preferred_element_type=jnp.float32) + b2_ref[...]
    h = jnp.maximum(h, 0.0)
    rx = jnp.dot(h, w3_ref[...], preferred_element_type=jnp.float32) + b3_ref[...]
    rx_ref[...] = rx.astype(rx_ref.dtype)


def _mlp(pooled, params):
    """Tiny epilogue: Linear(C,32)->ReLU->Linear(32,32)->ReLU->Linear(32,C)."""
    w1, b1, w2, b2, w3, b3 = params
    full = lambda a: pl.BlockSpec(a.shape, lambda: (0,) * a.ndim)
    return pl.pallas_call(
        _mlp_kernel,
        out_shape=jax.ShapeDtypeStruct(pooled.shape, jnp.float32),
        in_specs=[full(pooled), full(w1), full(b1), full(w2), full(b2),
                  full(w3), full(b3)],
        out_specs=pl.BlockSpec(pooled.shape, lambda: (0, 0)),
    )(pooled, w1, b1, w2, b2, w3, b3)


# ---------------------------------------------------------------- forward ---
def coae_forward(x_nchw, params, *, row_tile=512, hw_tile=4096):
    """x_nchw: (N, C, H, W) float32. Returns (pooled (N, C), Rx (N, C))."""
    n, c, h, w = x_nchw.shape
    nr, hw = n * c, h * w
    x2 = x_nchw.reshape(nr, hw)

    # Clamp tiles to the problem size, keeping (8, 128) layout alignment.
    row_tile = min(row_tile, _round_up(nr, 8))
    hw_tile = min(hw_tile, _round_up(hw, 128))

    # Megacore (v7x): make sure the "parallel" row axis has >= 2 blocks when
    # the problem allows it, so both TensorCores get work.
    while row_tile > 8 and pl.cdiv(nr, row_tile) < 2:
        row_tile = max(8, _round_up(row_tile // 2, 8))

    # Keep double-buffered input tiles + accumulator within the VMEM budget.
    budget = _vmem_budget()
    while hw_tile > 128 and (2 * row_tile * hw_tile * 4 + 8 * row_tile) > budget:
        hw_tile = max(128, (hw_tile // 2) // 128 * 128)

    pooled_col = _avg_pool_rows(x2, hw, row_tile=row_tile, hw_tile=hw_tile,
                                vmem_budget=budget)
    pooled = pooled_col[:, 0].reshape(n, c)

    # TODO(synk): PyTorch's .squeeze() would also drop the batch dim when N==1;
    # we keep the (N, C) shape here.
    rx = _mlp(pooled, params)
    return pooled, rx


# ------------------------------------------------------------------ params --
def init_params(key, in_channels, hidden=32):
    """Deterministic synthetic parameters matching nn.Linear shapes.
    PyTorch Linear stores weight as (out, in); here we keep (in, out) so the
    kernel does x @ W (mathematically identical to x @ W_pt.T)."""
    k1, k2, k3, k4, k5, k6 = jax.random.split(key, 6)
    w1 = jax.random.normal(k1, (in_channels, hidden), jnp.float32) * 0.1
    b1 = jax.random.normal(k2, (1, hidden), jnp.float32) * 0.1
    w2 = jax.random.normal(k3, (hidden, hidden), jnp.float32) * 0.1
    b2 = jax.random.normal(k4, (1, hidden), jnp.float32) * 0.1
    w3 = jax.random.normal(k5, (hidden, in_channels), jnp.float32) * 0.1
    b3 = jax.random.normal(k6, (1, in_channels), jnp.float32) * 0.1
    return (w1, b1, w2, b2, w3, b3)


def coae_reference(x_nchw, params):
    w1, b1, w2, b2, w3, b3 = params
    pooled = jnp.mean(x_nchw, axis=(2, 3))          # (N, C)
    h = jnp.maximum(pooled @ w1 + b1, 0.0)
    h = jnp.maximum(h @ w2 + b2, 0.0)
    rx = h @ w3 + b3
    return pooled, rx


if __name__ == "__main__":
    key = jax.random.PRNGKey(0)
    kx, kp = jax.random.split(key)

    N, C, H, W = 2, 4, 16, 16
    x = jax.random.normal(kx, (N, C, H, W), jnp.float32)
    params = init_params(kp, in_channels=C)

    pooled, rx = coae_forward(x, params)
    jax.block_until_ready((pooled, rx))

    ref_pooled, ref_rx = coae_reference(x, params)
    assert jnp.allclose(pooled, ref_pooled, atol=1e-5, rtol=1e-5)
    assert jnp.allclose(rx, ref_rx, atol=1e-5, rtol=1e-5)

    print("KERNEL_OK")
</pallas_src>

<mosaic_0001>
module attributes {stable_mosaic.version = 11 : i64} {
  func.func @_pool_kernel(%arg0: i32, %arg1: i32, %arg2: memref<8x256xf32, #tpu.memory_space<vmem>>, %arg3: memref<8x1xf32, #tpu.memory_space<vmem>>, %arg4: memref<8x1xf32, #tpu.memory_space<vmem>>) attributes {dimension_semantics = [#tpu.dimension_semantics<parallel>, #tpu.dimension_semantics<arbitrary>], iteration_bounds = array<i64: 1, 1>, scalar_prefetch = 0 : i64, scratch_operands = 1 : i64, tpu.core_type = #tpu.core_type<tc>, window_params = [{transform_indices = @transform_0, window_bounds = array<i64: 8, 256>}, {transform_indices = @transform_1, window_bounds = array<i64: 8, 1>}]} {
    %c0_i32 = arith.constant 0 : i32
    %0 = arith.cmpi eq, %arg1, %c0_i32 : i32
    %1 = arith.extui %0 : i1 to i32
    %c0_i32_0 = arith.constant 0 : i32
    %2 = arith.cmpi ne, %1, %c0_i32_0 : i32
    scf.if %2 {
      %cst_8 = arith.constant 0.000000e+00 : f32
      %12 = vector.broadcast %cst_8 : f32 to vector<8x1xf32>
      %c0_9 = arith.constant 0 : index
      %c0_10 = arith.constant 0 : index
      %13 = vector.load %arg4[%c0_9, %c0_10] : memref<8x1xf32, #tpu.memory_space<vmem>>, vector<8x1xf32>
      tpu.vector_store %arg4[%c0_9, %c0_10], %12 {strides = array<i32>} : memref<8x1xf32, #tpu.memory_space<vmem>>, vector<8x1xf32>,
    } else {
    }
    %c0 = arith.constant 0 : index
    %c0_1 = arith.constant 0 : index
    %3 = vector.load %arg2[%c0, %c0_1] : memref<8x256xf32, #tpu.memory_space<vmem>>, vector<8x256xf32>
    %c0_2 = arith.constant 0 : index
    %c0_3 = arith.constant 0 : index
    %4 = vector.load %arg4[%c0_2, %c0_3] : memref<8x1xf32, #tpu.memory_space<vmem>>, vector<8x1xf32>
    %cst = arith.constant dense<0.000000e+00> : vector<8xf32>
    %5 = vector.multi_reduction <add>, %3, %cst [1] : vector<8x256xf32> to vector<8xf32>
    %6 = vector.shape_cast %5 : vector<8xf32> to vector<8x1xf32>
    %7 = arith.addf %4, %6 : vector<8x1xf32>
    %c0_4 = arith.constant 0 : index
    %c0_5 = arith.constant 0 : index
    %8 = vector.load %arg4[%c0_4, %c0_5] : memref<8x1xf32, #tpu.memory_space<vmem>>, vector<8x1xf32>
    tpu.vector_store %arg4[%c0_4, %c0_5], %7 {strides = array<i32>} : memref<8x1xf32, #tpu.memory_space<vmem>>, vector<8x1xf32>,
    %c0_i32_6 = arith.constant 0 : i32
    %9 = arith.cmpi eq, %arg1, %c0_i32_6 : i32
    %10 = arith.extui %9 : i1 to i32
    %c0_i32_7 = arith.constant 0 : i32
    %11 = arith.cmpi ne, %10, %c0_i32_7 : i32
    scf.if %11 {
      %c0_8 = arith.constant 0 : index
      %c0_9 = arith.constant 0 : index
      %12 = vector.load %arg4[%c0_8, %c0_9] : memref<8x1xf32, #tpu.memory_space<vmem>>, vector<8x1xf32>
      %cst_10 = arith.constant 3.906250e-03 : f32
      %13 = vector.broadcast %cst_10 : f32 to vector<8x1xf32>
      %14 = arith.mulf %12, %13 : vector<8x1xf32>
      %c0_11 = arith.constant 0 : index
      %c0_12 = arith.constant 0 : index
      %15 = vector.load %arg3[%c0_11, %c0_12] : memref<8x1xf32, #tpu.memory_space<vmem>>, vector<8x1xf32>
      tpu.vector_store %arg3[%c0_11, %c0_12], %14 {strides = array<i32>} : memref<8x1xf32, #tpu.memory_space<vmem>>, vector<8x1xf32>,
    } else {
    }
    return
  }
  func.func @transform_0(%arg0: i32, %arg1: i32) -> (i32, i32) {
    %c0_i32 = arith.constant 0 : i32
    return %arg0, %arg1 : i32, i32
  }
  func.func @transform_1(%arg0: i32, %arg1: i32) -> (i32, i32) {
    %c0_i32 = arith.constant 0 : i32
    %c0_i32_0 = arith.constant 0 : i32
    return %arg0, %c0_i32 : i32, i32
  }
}

</mosaic_0001>

<bundles_post_ra>
// kernel: tpu_custom_call.1
= control target key start
LH: loop header
LB: loop body
LE: loop exit
PB: predicated region body
PF: predicated region fallthrough
CT: control target
= control target key end

     0   :  { %6 = vsyncpa [#allocation4], 0  ;;  %s72_s6 = smov [#allocation3]   ;;  %s99_s0 = inlined_call_operand.hbm [shape: f32[8,256], index: 0, kind: input, shape index: {}]   ;;  %s100_s1 = inlined_call_operand.vmem [shape: f32[8,1], index: 1, kind: output, shape index: {}]  }
   0x1   :  { %s13_s7 = sshll.u32 %s72_s6, 4  ;;  %s48_s10 = scalar_lea.hbm %s99_s0, 256  ;;  %s14_s7 = int_to_ptr.vmem [resolvable:$true] %s13_s7 }
   0x2   :  { %p49_p0 = scmp.ne.s32.totalorder %s99_s0, %s48_s10  ;;  %p52_p1 = scmp.lt.u32.totalorder %s48_s10, %s99_s0 }
   0x4   :  { %p54_p2 = pnand %p52_p1, %p49_p0 }
   0x6   :  { %57 = shalt.err (!%p54_p2)
}
   0x7   :  { %s58_s15 = scalar_lea.vmem %s14_s7, 256  ;;  %p63_p4 = scmp.lt.s32.totalorder %s14_s7, %s14_s7 }
   0x8   :  { %p59_p3 = scmp.ne.s32.totalorder %s14_s7, %s58_s15  ;;  %p64_p5 = scmp.lt.s32.totalorder %s58_s15, %s58_s15 }
   0xa   :  { %p65_p6 = por %p64_p5, %p63_p4 }
   0xc   :  { %p66_p7 = pnand %p65_p6, %p59_p3 }
   0xe   :  { %69 = shalt.err (!%p66_p7)
}
   0xf   :  { %16 = dma.hbm_to_vmem [thread:$0]  %s99_s0, 256, %s14_s7, [#allocation4]  }
  0x10   :  { %70 = dma.done.wait [#allocation4], 256  }
  0x11   :  { %71 = vsyncadd [#allocation4], 4294967040  ;;  %vm24_vm0 = vcmask 7168   ;;  %v73_v0 = vmov 0.0   ;;  %v26_v1 = vld [vmem:[#allocation3] sm:$0xff]  ;;  %v27_v2 = vld [vmem:[#allocation3 + $0x8] sm:$0xff] }
  0x12   :  { %25 = vst.msk [vmem:[#allocation2] sm:$0xff] %vm24_vm0, %v73_v0  ;;  %v29_v3 = vadd.f32 %v27_v2, %v26_v1 }
  0x14   :  { %30 = vadd.xlane.f32.xlu0 %v29_v3 }
  0x19   :  { %v28_v4 = vld [vmem:[#allocation2] sm:$0xff] }
  0xa1   :  { %v31_v5 = vpop.xlane.xlu0 %30 }
  0xa2   :  { %v32_v6 = vadd.f32 %v31_v5, %v28_v4 }
  0xa4   :  { %34 = vst.msk [vmem:[#allocation2] sm:$0xff] %vm24_vm0, %v32_v6 }
  0xab   :  { %v38_v7 = vld [vmem:[#allocation2] sm:$0xff] }
  0xac   :  { %v39_v8 = vmul.f32 0.00390625, %v38_v7 }
  0xae   :  { %40 = vst.msk [vmem:[%s100_s1] sm:$0xff] %vm24_vm0, %v39_v8 }
  0xaf   :  { %45 = vsyncpa [#allocation4], 1 }

</bundles_post_ra>
